<compile_context>
chip_gen: v7x
topology: tpu7x:2x2x1
jax: 0.10.0
libtpu: 0.0.40
codegen_flags: <defaults>
</compile_context>

<pallas_src>
import functools

import jax
import jax.numpy as jnp
from jax import lax
from jax.experimental import pallas as pl
from jax.experimental.pallas import tpu as pltpu


def _conv_encoder_kernel(x_ref, wdw_ref, bdw_ref, wpw_ref, bpw_ref,
                         gamma_ref, beta_ref, out_ref, *, L, K, eps):
    """One block of B_T batch elements, flattened to (B_T*L, D) rows.

    x_ref  : (BL, D)  activations (also the residual)
    wdw_ref: (K, D)   depthwise conv weights (tap j, channel d)
    bdw_ref: (1, D)   depthwise bias
    wpw_ref: (D, D)   pointwise weights, (D_in, D_out); may be bf16
    bpw_ref: (1, D)   pointwise bias
    gamma_ref, beta_ref: (1, D) LayerNorm affine params
    out_ref: (BL, D)
    """
    BL, D = x_ref.shape
    pad = K // 2

    x = x_ref[...].astype(jnp.float32)                       # (BL, D)

    # Position of each row inside its length-L sequence (for 'same'-padding masks).
    row = lax.broadcasted_iota(jnp.int32, (BL, 1), 0)
    l_idx = row % L

    # ---- depthwise conv along L (per-channel FIR), zero padding via masking ----
    acc = jnp.broadcast_to(bdw_ref[...], (BL, D)).astype(jnp.float32)
    for j in range(K):                                       # static unroll, K = 7
        shift = pad - j
        w_j = wdw_ref[j, :][None, :]                         # (1, D)
        if shift == 0:
            acc = acc + x * w_j
        else:
            # Cyclic rotate by the non-negative equivalent amount; rows that would
            # wrap across a sequence (or batch) boundary are masked to zero below,
            # which reproduces Conv1d(padding=K//2) zero padding exactly.
            xs = pltpu.roll(x, shift % BL, axis=0)           # XLU sublane rotate
            if shift > 0:
                valid = l_idx >= shift                       # rows that would read l < 0
            else:
                valid = l_idx < L + shift                    # rows that would read l >= L
            acc = acc + jnp.where(valid, xs, 0.0) * w_j

    # ---- pointwise 1x1 conv == channel matmul on the MXU ----
    y = jnp.dot(acc.astype(wpw_ref.dtype), wpw_ref[...],
                preferred_element_type=jnp.float32)
    y = y + bpw_ref[...]

    # ---- ReLU ----
    y = jnp.maximum(y, 0.0)

    # ---- dropout (identity at inference) + residual ----
    h = y + x

    # ---- LayerNorm over channel dim D (single-pass stats: independent reductions) ----
    inv_d = jnp.float32(1.0 / D)
    s1 = jnp.sum(h, axis=-1, keepdims=True)
    s2 = jnp.sum(h * h, axis=-1, keepdims=True)
    mean = s1 * inv_d
    var = s2 * inv_d - mean * mean
    normed = (h - mean) * lax.rsqrt(var + eps)
    out = normed * gamma_ref[...] + beta_ref[...]

    out_ref[...] = out.astype(out_ref.dtype)


def _pick_batch_tile(N, L, target_rows=512):
    """Largest divisor of N such that B_T*L is sublane-aligned and <= target_rows."""
    divisors = [d for d in range(1, N + 1) if N % d == 0]
    ok = [d for d in divisors if (d * L) % 8 == 0]
    if not ok:
        return N                      # full-array block is always a legal block shape
    under = [d for d in ok if d * L <= target_rows]
    return max(under) if under else min(ok)


def conv_encoder(x, w_dw, b_dw, w_pw, b_pw, gamma, beta, *,
                 kernel_size=7, eps=1e-5, use_bf16_matmul=False, batch_tile=None):
    """x: (N, L, D) float32.  Returns (N, L, D)."""
    N, L, D = x.shape
    K = kernel_size
    assert K % 2 == 1, "only odd kernel_size reproduces PyTorch Conv1d(padding=K//2) length"

    # glue: reshape PyTorch-shaped params into kernel-friendly layouts
    wdw = jnp.transpose(w_dw[:, 0, :], (1, 0))     # (D, 1, K) -> (K, D)
    bdw = b_dw.reshape(1, D)
    wpw = jnp.transpose(w_pw[:, :, 0], (1, 0))     # (D_out, D_in, 1) -> (D_in, D_out)
    bpw = b_pw.reshape(1, D)
    g = gamma.reshape(1, D)
    b = beta.reshape(1, D)
    if use_bf16_matmul:
        wpw = wpw.astype(jnp.bfloat16)             # halves weight DMA, MXU bf16 path

    B_T = batch_tile if batch_tile is not None else _pick_batch_tile(N, L)
    assert N % B_T == 0
    BL = B_T * L
    num_blocks = N // B_T

    # Free, contiguous reshape: rows stay in (batch-major, seq) order.
    x2 = x.reshape(N * L, D)

    kernel = functools.partial(_conv_encoder_kernel, L=L, K=K, eps=eps)

    out2 = pl.pallas_call(
        kernel,
        out_shape=jax.ShapeDtypeStruct((N * L, D), x.dtype),
        grid_spec=pltpu.PrefetchScalarGridSpec(
            num_scalar_prefetch=0,
            grid=(num_blocks,),
            in_specs=[
                pl.BlockSpec((BL, D), lambda n: (n, 0)),   # activations (input + residual)
                pl.BlockSpec((K, D), lambda n: (0, 0)),    # depthwise weights
                pl.BlockSpec((1, D), lambda n: (0, 0)),    # depthwise bias
                pl.BlockSpec((D, D), lambda n: (0, 0)),    # pointwise weights
                pl.BlockSpec((1, D), lambda n: (0, 0)),    # pointwise bias
                pl.BlockSpec((1, D), lambda n: (0, 0)),    # LN gamma
                pl.BlockSpec((1, D), lambda n: (0, 0)),    # LN beta
            ],
            out_specs=pl.BlockSpec((BL, D), lambda n: (n, 0)),
        ),
        compiler_params=pltpu.CompilerParams(
            dimension_semantics=("parallel",)),
    )(x2, wdw, bdw, wpw, bpw, g, b)

    return out2.reshape(N, L, D)


def conv_encoder_ref(x, w_dw, b_dw, w_pw, b_pw, gamma, beta, *, kernel_size=7, eps=1e-5):
    """Pure-JAX reference (same math as the PyTorch module, channels-last)."""
    N, L, D = x.shape
    K = kernel_size
    pad = K // 2
    x_pad = jnp.pad(x, ((0, 0), (pad, pad), (0, 0)))
    wdw = jnp.transpose(w_dw[:, 0, :], (1, 0))     # (K, D)
    acc = jnp.zeros((N, L, D), jnp.float32) + b_dw[None, None, :]
    for j in range(K):
        acc = acc + x_pad[:, j:j + L, :] * wdw[j][None, None, :]
    y = jnp.einsum("nld,od->nlo", acc, w_pw[:, :, 0]) + b_pw[None, None, :]
    y = jnp.maximum(y, 0.0)
    h = y + x
    mean = jnp.mean(h, axis=-1, keepdims=True)
    var = jnp.mean((h - mean) ** 2, axis=-1, keepdims=True)
    return (h - mean) * lax.rsqrt(var + eps) * gamma[None, None, :] + beta[None, None, :]


if __name__ == "__main__":
    N, L, D, K = 4, 16, 128, 7   # n_filters=128 (module default), kernel_size=7

    key = jax.random.PRNGKey(0)
    k_x, k_dw, k_bdw, k_pw, k_bpw = jax.random.split(key, 5)

    x = jax.random.normal(k_x, (N, L, D), jnp.float32)

    # parameter shapes mirror the PyTorch module __init__
    w_dw = jax.random.normal(k_dw, (D, 1, K), jnp.float32) * 0.1   # Conv1d groups=D weight
    b_dw = jax.random.normal(k_bdw, (D,), jnp.float32) * 0.1
    w_pw = jax.random.normal(k_pw, (D, D, 1), jnp.float32) * 0.05  # Conv1d 1x1 weight
    b_pw = jax.random.normal(k_bpw, (D,), jnp.float32) * 0.1
    gamma = jnp.ones((D,), jnp.float32)                            # LayerNorm default init
    beta = jnp.zeros((D,), jnp.float32)

    ref = conv_encoder_ref(x, w_dw, b_dw, w_pw, b_pw, gamma, beta, kernel_size=K)

    # f32 matmul path (exact semantics)
    out = conv_encoder(x, w_dw, b_dw, w_pw, b_pw, gamma, beta, kernel_size=K)
    out = jax.block_until_ready(out)
    assert out.shape == (N, L, D)
    assert jnp.allclose(out, ref, atol=1e-4, rtol=1e-4), "f32 kernel mismatch vs reference"

    # bf16-input matmul path (v6e/v7x MXU fast path; accumulation + LN stay f32)
    out_bf16 = conv_encoder(x, w_dw, b_dw, w_pw, b_pw, gamma, beta,
                            kernel_size=K, use_bf16_matmul=True)
    out_bf16 = jax.block_until_ready(out_bf16)
    assert jnp.allclose(out_bf16, ref, atol=5e-2, rtol=5e-2), "bf16-matmul kernel mismatch"

    print("KERNEL_OK")
</pallas_src>

<mosaic_0001>
module attributes {stable_mosaic.version = 11 : i64} {
  func.func @_conv_encoder_kernel(%arg0: i32, %arg1: memref<64x128xf32, #tpu.memory_space<vmem>>, %arg2: memref<7x128xf32, #tpu.memory_space<vmem>>, %arg3: memref<1x128xf32, #tpu.memory_space<vmem>>, %arg4: memref<128x128xf32, #tpu.memory_space<vmem>>, %arg5: memref<1x128xf32, #tpu.memory_space<vmem>>, %arg6: memref<1x128xf32, #tpu.memory_space<vmem>>, %arg7: memref<1x128xf32, #tpu.memory_space<vmem>>, %arg8: memref<64x128xf32, #tpu.memory_space<vmem>>) attributes {dimension_semantics = [#tpu.dimension_semantics<parallel>], iteration_bounds = array<i64: 1>, scalar_prefetch = 0 : i64, scratch_operands = 0 : i64, tpu.core_type = #tpu.core_type<tc>, window_params = [{transform_indices = @transform_0, window_bounds = array<i64: 64, 128>}, {pipeline_mode = #tpu.pipeline_mode<synchronous>, transform_indices = @transform_1, window_bounds = array<i64: 7, 128>}, {pipeline_mode = #tpu.pipeline_mode<synchronous>, transform_indices = @transform_2, window_bounds = array<i64: 1, 128>}, {pipeline_mode = #tpu.pipeline_mode<synchronous>, transform_indices = @transform_3, window_bounds = array<i64: 128, 128>}, {pipeline_mode = #tpu.pipeline_mode<synchronous>, transform_indices = @transform_4, window_bounds = array<i64: 1, 128>}, {pipeline_mode = #tpu.pipeline_mode<synchronous>, transform_indices = @transform_5, window_bounds = array<i64: 1, 128>}, {pipeline_mode = #tpu.pipeline_mode<synchronous>, transform_indices = @transform_6, window_bounds = array<i64: 1, 128>}, {transform_indices = @transform_7, window_bounds = array<i64: 64, 128>}]} {
    %c0 = arith.constant 0 : index
    %c0_0 = arith.constant 0 : index
    %0 = vector.load %arg1[%c0, %c0_0] : memref<64x128xf32, #tpu.memory_space<vmem>>, vector<64x128xf32>
    %1 = tpu.iota {dimensions = array<i32: 0>} : vector<64x1xi32>
    %c16_i32 = arith.constant 16 : i32
    %c0_i32 = arith.constant 0 : i32
    %2 = arith.cmpi eq, %c16_i32, %c0_i32 : i32
    %c1_i32 = arith.constant 1 : i32
    %3 = arith.select %2, %c1_i32, %c16_i32 : i32
    %4 = vector.broadcast %3 : i32 to vector<64x1xi32>
    %5 = arith.remsi %1, %4 : vector<64x1xi32>
    %c0_i32_1 = arith.constant 0 : i32
    %6 = vector.broadcast %c0_i32_1 : i32 to vector<64x1xi32>
    %7 = arith.cmpi ne, %5, %6 : vector<64x1xi32>
    %c0_i32_2 = arith.constant 0 : i32
    %8 = vector.broadcast %c0_i32_2 : i32 to vector<64x1xi32>
    %9 = arith.cmpi slt, %5, %8 : vector<64x1xi32>
    %c0_i32_3 = arith.constant 0 : i32
    %10 = arith.cmpi slt, %3, %c0_i32_3 : i32
    %11 = vector.broadcast %10 : i1 to vector<64x1xi1>
    %12 = vector.broadcast %11 : vector<64x1xi1> to vector<64x1xi1>
    %13 = arith.xori %9, %12 : vector<64x1xi1>
    %14 = arith.andi %13, %7 : vector<64x1xi1>
    %15 = vector.broadcast %3 : i32 to vector<64x1xi32>
    %16 = arith.addi %5, %15 : vector<64x1xi32>
    %17 = arith.select %14, %16, %5 : vector<64x1xi1>, vector<64x1xi32>
    %c0_4 = arith.constant 0 : index
    %c0_5 = arith.constant 0 : index
    %18 = vector.load %arg3[%c0_4, %c0_5] : memref<1x128xf32, #tpu.memory_space<vmem>>, vector<1x128xf32>
    %19 = vector.shape_cast %18 : vector<1x128xf32> to vector<1x128xf32>
    %20 = vector.broadcast %19 : vector<1x128xf32> to vector<64x128xf32>
    %c0_6 = arith.constant 0 : index
    %c0_7 = arith.constant 0 : index
    %21 = vector.load %arg2[%c0_6, %c0_7] : memref<7x128xf32, #tpu.memory_space<vmem>>, vector<1x128xf32>
    %22 = vector.shape_cast %21 : vector<1x128xf32> to vector<128xf32>
    %23 = vector.shape_cast %22 : vector<128xf32> to vector<1x128xf32>
    %c3_i32 = arith.constant 3 : i32
    %24 = tpu.dynamic_rotate %0 by %c3_i32 dim 0 : vector<64x128xf32>, i32 -> vector<64x128xf32>
    %c3_i32_8 = arith.constant 3 : i32
    %25 = vector.broadcast %c3_i32_8 : i32 to vector<64x1xi32>
    %26 = arith.cmpi sge, %17, %25 : vector<64x1xi32>
    %cst = arith.constant 0.000000e+00 : f32
    %27 = vector.shape_cast %26 : vector<64x1xi1> to vector<64x1xi1>
    %28 = vector.broadcast %27 : vector<64x1xi1> to vector<64x128xi1>
    %29 = vector.broadcast %cst : f32 to vector<64x128xf32>
    %30 = arith.select %28, %24, %29 : vector<64x128xi1>, vector<64x128xf32>
    %31 = vector.broadcast %23 : vector<1x128xf32> to vector<64x128xf32>
    %32 = arith.mulf %30, %31 : vector<64x128xf32>
    %33 = arith.addf %20, %32 : vector<64x128xf32>
    %c1 = arith.constant 1 : index
    %c0_9 = arith.constant 0 : index
    %34 = vector.load %arg2[%c1, %c0_9] : memref<7x128xf32, #tpu.memory_space<vmem>>, vector<1x128xf32>
    %35 = vector.shape_cast %34 : vector<1x128xf32> to vector<128xf32>
    %36 = vector.shape_cast %35 : vector<128xf32> to vector<1x128xf32>
    %c2_i32 = arith.constant 2 : i32
    %37 = tpu.dynamic_rotate %0 by %c2_i32 dim 0 : vector<64x128xf32>, i32 -> vector<64x128xf32>
    %c2_i32_10 = arith.constant 2 : i32
    %38 = vector.broadcast %c2_i32_10 : i32 to vector<64x1xi32>
    %39 = arith.cmpi sge, %17, %38 : vector<64x1xi32>
    %cst_11 = arith.constant 0.000000e+00 : f32
    %40 = vector.shape_cast %39 : vector<64x1xi1> to vector<64x1xi1>
    %41 = vector.broadcast %40 : vector<64x1xi1> to vector<64x128xi1>
    %42 = vector.broadcast %cst_11 : f32 to vector<64x128xf32>
    %43 = arith.select %41, %37, %42 : vector<64x128xi1>, vector<64x128xf32>
    %44 = vector.broadcast %36 : vector<1x128xf32> to vector<64x128xf32>
    %45 = arith.mulf %43, %44 : vector<64x128xf32>
    %46 = arith.addf %33, %45 : vector<64x128xf32>
    %c2 = arith.constant 2 : index
    %c0_12 = arith.constant 0 : index
    %47 = vector.load %arg2[%c2, %c0_12] : memref<7x128xf32, #tpu.memory_space<vmem>>, vector<1x128xf32>
    %48 = vector.shape_cast %47 : vector<1x128xf32> to vector<128xf32>
    %49 = vector.shape_cast %48 : vector<128xf32> to vector<1x128xf32>
    %c1_i32_13 = arith.constant 1 : i32
    %50 = tpu.dynamic_rotate %0 by %c1_i32_13 dim 0 : vector<64x128xf32>, i32 -> vector<64x128xf32>
    %c1_i32_14 = arith.constant 1 : i32
    %51 = vector.broadcast %c1_i32_14 : i32 to vector<64x1xi32>
    %52 = arith.cmpi sge, %17, %51 : vector<64x1xi32>
    %cst_15 = arith.constant 0.000000e+00 : f32
    %53 = vector.shape_cast %52 : vector<64x1xi1> to vector<64x1xi1>
    %54 = vector.broadcast %53 : vector<64x1xi1> to vector<64x128xi1>
    %55 = vector.broadcast %cst_15 : f32 to vector<64x128xf32>
    %56 = arith.select %54, %50, %55 : vector<64x128xi1>, vector<64x128xf32>
    %57 = vector.broadcast %49 : vector<1x128xf32> to vector<64x128xf32>
    %58 = arith.mulf %56, %57 : vector<64x128xf32>
    %59 = arith.addf %46, %58 : vector<64x128xf32>
    %c3 = arith.constant 3 : index
    %c0_16 = arith.constant 0 : index
    %60 = vector.load %arg2[%c3, %c0_16] : memref<7x128xf32, #tpu.memory_space<vmem>>, vector<1x128xf32>
    %61 = vector.shape_cast %60 : vector<1x128xf32> to vector<128xf32>
    %62 = vector.shape_cast %61 : vector<128xf32> to vector<1x128xf32>
    %63 = vector.broadcast %62 : vector<1x128xf32> to vector<64x128xf32>
    %64 = arith.mulf %0, %63 : vector<64x128xf32>
    %65 = arith.addf %59, %64 : vector<64x128xf32>
    %c4 = arith.constant 4 : index
    %c0_17 = arith.constant 0 : index
    %66 = vector.load %arg2[%c4, %c0_17] : memref<7x128xf32, #tpu.memory_space<vmem>>, vector<1x128xf32>
    %67 = vector.shape_cast %66 : vector<1x128xf32> to vector<128xf32>
    %68 = vector.shape_cast %67 : vector<128xf32> to vector<1x128xf32>
    %c63_i32 = arith.constant 63 : i32
    %69 = tpu.dynamic_rotate %0 by %c63_i32 dim 0 : vector<64x128xf32>, i32 -> vector<64x128xf32>
    %c15_i32 = arith.constant 15 : i32
    %70 = vector.broadcast %c15_i32 : i32 to vector<64x1xi32>
    %71 = arith.cmpi slt, %17, %70 : vector<64x1xi32>
    %cst_18 = arith.constant 0.000000e+00 : f32
    %72 = vector.shape_cast %71 : vector<64x1xi1> to vector<64x1xi1>
    %73 = vector.broadcast %72 : vector<64x1xi1> to vector<64x128xi1>
    %74 = vector.broadcast %cst_18 : f32 to vector<64x128xf32>
    %75 = arith.select %73, %69, %74 : vector<64x128xi1>, vector<64x128xf32>
    %76 = vector.broadcast %68 : vector<1x128xf32> to vector<64x128xf32>
    %77 = arith.mulf %75, %76 : vector<64x128xf32>
    %78 = arith.addf %65, %77 : vector<64x128xf32>
    %c5 = arith.constant 5 : index
    %c0_19 = arith.constant 0 : index
    %79 = vector.load %arg2[%c5, %c0_19] : memref<7x128xf32, #tpu.memory_space<vmem>>, vector<1x128xf32>
    %80 = vector.shape_cast %79 : vector<1x128xf32> to vector<128xf32>
    %81 = vector.shape_cast %80 : vector<128xf32> to vector<1x128xf32>
    %c62_i32 = arith.constant 62 : i32
    %82 = tpu.dynamic_rotate %0 by %c62_i32 dim 0 : vector<64x128xf32>, i32 -> vector<64x128xf32>
    %c14_i32 = arith.constant 14 : i32
    %83 = vector.broadcast %c14_i32 : i32 to vector<64x1xi32>
    %84 = arith.cmpi slt, %17, %83 : vector<64x1xi32>
    %cst_20 = arith.constant 0.000000e+00 : f32
    %85 = vector.shape_cast %84 : vector<64x1xi1> to vector<64x1xi1>
    %86 = vector.broadcast %85 : vector<64x1xi1> to vector<64x128xi1>
    %87 = vector.broadcast %cst_20 : f32 to vector<64x128xf32>
    %88 = arith.select %86, %82, %87 : vector<64x128xi1>, vector<64x128xf32>
    %89 = vector.broadcast %81 : vector<1x128xf32> to vector<64x128xf32>
    %90 = arith.mulf %88, %89 : vector<64x128xf32>
    %91 = arith.addf %78, %90 : vector<64x128xf32>
    %c6 = arith.constant 6 : index
    %c0_21 = arith.constant 0 : index
    %92 = vector.load %arg2[%c6, %c0_21] : memref<7x128xf32, #tpu.memory_space<vmem>>, vector<1x128xf32>
    %93 = vector.shape_cast %92 : vector<1x128xf32> to vector<128xf32>
    %94 = vector.shape_cast %93 : vector<128xf32> to vector<1x128xf32>
    %c61_i32 = arith.constant 61 : i32
    %95 = tpu.dynamic_rotate %0 by %c61_i32 dim 0 : vector<64x128xf32>, i32 -> vector<64x128xf32>
    %c13_i32 = arith.constant 13 : i32
    %96 = vector.broadcast %c13_i32 : i32 to vector<64x1xi32>
    %97 = arith.cmpi slt, %17, %96 : vector<64x1xi32>
    %cst_22 = arith.constant 0.000000e+00 : f32
    %98 = vector.shape_cast %97 : vector<64x1xi1> to vector<64x1xi1>
    %99 = vector.broadcast %98 : vector<64x1xi1> to vector<64x128xi1>
    %100 = vector.broadcast %cst_22 : f32 to vector<64x128xf32>
    %101 = arith.select %99, %95, %100 : vector<64x128xi1>, vector<64x128xf32>
    %102 = vector.broadcast %94 : vector<1x128xf32> to vector<64x128xf32>
    %103 = arith.mulf %101, %102 : vector<64x128xf32>
    %104 = arith.addf %91, %103 : vector<64x128xf32>
    %c0_23 = arith.constant 0 : index
    %c0_24 = arith.constant 0 : index
    %105 = vector.load %arg4[%c0_23, %c0_24] : memref<128x128xf32, #tpu.memory_space<vmem>>, vector<128x128xf32>
    %cst_25 = arith.constant dense<0.000000e+00> : vector<64x128xf32>
    %106 = tpu.matmul %104, %105, %cst_25 {dimension_numbers = #tpu.dot_dimension_numbers<[1], [0], [0], [1], [0, 0, 1, 1], [], []>} : vector<64x128xf32>, vector<128x128xf32>, vector<64x128xf32> -> vector<64x128xf32>
    %c0_26 = arith.constant 0 : index
    %c0_27 = arith.constant 0 : index
    %107 = vector.load %arg5[%c0_26, %c0_27] : memref<1x128xf32, #tpu.memory_space<vmem>>, vector<1x128xf32>
    %108 = vector.broadcast %107 : vector<1x128xf32> to vector<64x128xf32>
    %109 = arith.addf %106, %108 : vector<64x128xf32>
    %cst_28 = arith.constant 0.000000e+00 : f32
    %110 = vector.broadcast %cst_28 : f32 to vector<64x128xf32>
    %111 = arith.maximumf %109, %110 : vector<64x128xf32>
    %112 = arith.addf %111, %0 : vector<64x128xf32>
    %cst_29 = arith.constant dense<0.000000e+00> : vector<64xf32>
    %113 = vector.multi_reduction <add>, %112, %cst_29 [1] : vector<64x128xf32> to vector<64xf32>
    %114 = vector.shape_cast %113 : vector<64xf32> to vector<64x1xf32>
    %115 = arith.mulf %112, %112 : vector<64x128xf32>
    %cst_30 = arith.constant dense<0.000000e+00> : vector<64xf32>
    %116 = vector.multi_reduction <add>, %115, %cst_30 [1] : vector<64x128xf32> to vector<64xf32>
    %117 = vector.shape_cast %116 : vector<64xf32> to vector<64x1xf32>
    %cst_31 = arith.constant 7.812500e-03 : f32
    %118 = vector.broadcast %cst_31 : f32 to vector<64x1xf32>
    %119 = arith.mulf %114, %118 : vector<64x1xf32>
    %cst_32 = arith.constant 7.812500e-03 : f32
    %120 = vector.broadcast %cst_32 : f32 to vector<64x1xf32>
    %121 = arith.mulf %117, %120 : vector<64x1xf32>
    %122 = arith.mulf %119, %119 : vector<64x1xf32>
    %123 = arith.subf %121, %122 : vector<64x1xf32>
    %124 = vector.broadcast %119 : vector<64x1xf32> to vector<64x128xf32>
    %125 = arith.subf %112, %124 : vector<64x128xf32>
    %cst_33 = arith.constant 9.99999974E-6 : f32
    %126 = vector.broadcast %cst_33 : f32 to vector<64x1xf32>
    %127 = arith.addf %123, %126 : vector<64x1xf32>
    %128 = math.rsqrt %127 : vector<64x1xf32>
    %129 = vector.broadcast %128 : vector<64x1xf32> to vector<64x128xf32>
    %130 = arith.mulf %125, %129 : vector<64x128xf32>
    %c0_34 = arith.constant 0 : index
    %c0_35 = arith.constant 0 : index
    %131 = vector.load %arg6[%c0_34, %c0_35] : memref<1x128xf32, #tpu.memory_space<vmem>>, vector<1x128xf32>
    %132 = vector.broadcast %131 : vector<1x128xf32> to vector<64x128xf32>
    %133 = arith.mulf %130, %132 : vector<64x128xf32>
    %c0_36 = arith.constant 0 : index
    %c0_37 = arith.constant 0 : index
    %134 = vector.load %arg7[%c0_36, %c0_37] : memref<1x128xf32, #tpu.memory_space<vmem>>, vector<1x128xf32>
    %135 = vector.broadcast %134 : vector<1x128xf32> to vector<64x128xf32>
    %136 = arith.addf %133, %135 : vector<64x128xf32>
    %c0_38 = arith.constant 0 : index
    %c0_39 = arith.constant 0 : index
    %137 = vector.load %arg8[%c0_38, %c0_39] : memref<64x128xf32, #tpu.memory_space<vmem>>, vector<64x128xf32>
    tpu.vector_store %arg8[%c0_38, %c0_39], %136 {strides = array<i32>} : memref<64x128xf32, #tpu.memory_space<vmem>>, vector<64x128xf32>,
    return
  }
  func.func @transform_0(%arg0: i32) -> (i32, i32) {
    %c0_i32 = arith.constant 0 : i32
    %c0_i32_0 = arith.constant 0 : i32
    return %arg0, %c0_i32 : i32, i32
  }
  func.func @transform_1(%arg0: i32) -> (i32, i32) {
    %c0_i32 = arith.constant 0 : i32
    %c0_i32_0 = arith.constant 0 : i32
    %c0_i32_1 = arith.constant 0 : i32
    return %c0_i32, %c0_i32_0 : i32, i32
  }
  func.func @transform_2(%arg0: i32) -> (i32, i32) {
    %c0_i32 = arith.constant 0 : i32
    %c0_i32_0 = arith.constant 0 : i32
    %c0_i32_1 = arith.constant 0 : i32
    return %c0_i32, %c0_i32_0 : i32, i32
  }
  func.func @transform_3(%arg0: i32) -> (i32, i32) {
    %c0_i32 = arith.constant 0 : i32
    %c0_i32_0 = arith.constant 0 : i32
    %c0_i32_1 = arith.constant 0 : i32
    return %c0_i32, %c0_i32_0 : i32, i32
  }
  func.func @transform_4(%arg0: i32) -> (i32, i32) {
    %c0_i32 = arith.constant 0 : i32
    %c0_i32_0 = arith.constant 0 : i32
    %c0_i32_1 = arith.constant 0 : i32
    return %c0_i32, %c0_i32_0 : i32, i32
  }
  func.func @transform_5(%arg0: i32) -> (i32, i32) {
    %c0_i32 = arith.constant 0 : i32
    %c0_i32_0 = arith.constant 0 : i32
    %c0_i32_1 = arith.constant 0 : i32
    return %c0_i32, %c0_i32_0 : i32, i32
  }
  func.func @transform_6(%arg0: i32) -> (i32, i32) {
    %c0_i32 = arith.constant 0 : i32
    %c0_i32_0 = arith.constant 0 : i32
    %c0_i32_1 = arith.constant 0 : i32
    return %c0_i32, %c0_i32_0 : i32, i32
  }
  func.func @transform_7(%arg0: i32) -> (i32, i32) {
    %c0_i32 = arith.constant 0 : i32
    %c0_i32_0 = arith.constant 0 : i32
    return %arg0, %c0_i32 : i32, i32
  }
}

</mosaic_0001>

<bundles_post_ra>
// kernel: tpu_custom_call.1
= control target key start
LH: loop header
LB: loop body
LE: loop exit
PB: predicated region body
PF: predicated region fallthrough
CT: control target
= control target key end

     0   :  { %12 = vsyncpa [#allocation3], 0  ;;  %s1863_s0 = inlined_call_operand.hbm [shape: f32[64,128], index: 0, kind: input, shape index: {}]   ;;  %s1864_s1 = inlined_call_operand.hbm [shape: f32[7,128], index: 1, kind: input, shape index: {}]   ;;  %s1865_s2 = inlined_call_operand.vmem [shape: f32[1,128], index: 2, kind: input, shape index: {}]   ;;  %s1866_s3 = inlined_call_operand.hbm [shape: f32[128,128], index: 3, kind: input, shape index: {}]   ;;  %s1867_s4 = inlined_call_operand.vmem [shape: f32[1,128], index: 4, kind: input, shape index: {}]   ;;  %s1868_s5 = inlined_call_operand.vmem [shape: f32[1,128], index: 5, kind: input, shape index: {}]   ;;  %s1869_s6 = inlined_call_operand.vmem [shape: f32[1,128], index: 6, kind: input, shape index: {}]   ;;  %s1870_s7 = inlined_call_operand.hbm [shape: f32[64,128], index: 7, kind: output, shape index: {}]  }
   0x1   :  { %13 = vsyncpa [#allocation6], 0 }
   0x2   :  { %14 = vsyncpa [#allocation4], 0  ;;  %s1174_s24 = smov [#allocation5]   ;;  %s1175_s26 = smov [#allocation2]  }
   0x3   :  { %s33_s25 = sshll.u32 %s1174_s24, 4  ;;  %s20_s27 = sshll.u32 %s1175_s26, 4  ;;  %s34_s25 = int_to_ptr.vmem [resolvable:$true] %s33_s25  ;;  %s1220_s27 = int_to_ptr.vmem [resolvable:$true] %s20_s27 }
   0x4   :  { %s1080_s30 = scalar_lea.hbm %s1864_s1, 128 }
   0x5   :  { %p1081_p0 = scmp.ne.s32.totalorder %s1864_s1, %s1080_s30  ;;  %p1084_p1 = scmp.lt.u32.totalorder %s1080_s30, %s1864_s1 }
   0x7   :  { %p1086_p2 = pnand %p1084_p1, %p1081_p0 }
   0x9   :  { %1089 = shalt.err (!%p1086_p2)
}
   0xa   :  { %s1090_s12 = scalar_lea.vmem %s34_s25, 128  ;;  %p1095_p4 = scmp.lt.s32.totalorder %s34_s25, %s34_s25 }
   0xb   :  { %p1091_p3 = scmp.ne.s32.totalorder %s34_s25, %s1090_s12  ;;  %p1096_p5 = scmp.lt.s32.totalorder %s1090_s12, %s1090_s12 }
   0xd   :  { %p1097_p6 = por %p1096_p5, %p1095_p4 }
   0xf   :  { %p1098_p7 = pnand %p1097_p6, %p1091_p3 }
  0x11   :  { %1101 = shalt.err (!%p1098_p7)
}
  0x12   :  { %36 = dma.hbm_to_vmem [thread:$0]  %s1864_s1, 128, %s34_s25, [#allocation6]  }
  0x13   :  { %s1102_s17 = scalar_lea.hbm %s1863_s0, 1024 }
  0x14   :  { %p1103_p8 = scmp.ne.s32.totalorder %s1863_s0, %s1102_s17  ;;  %p1106_p9 = scmp.lt.u32.totalorder %s1102_s17, %s1863_s0 }
  0x16   :  { %p1108_p10 = pnand %p1106_p9, %p1103_p8 }
  0x18   :  { %1111 = shalt.err (!%p1108_p10)
}
  0x19   :  { %s1112_s22 = scalar_lea.vmem %s1220_s27, 1024  ;;  %p1117_p12 = scmp.lt.s32.totalorder %s1220_s27, %s1220_s27 }
  0x1a   :  { %p1113_p11 = scmp.ne.s32.totalorder %s1220_s27, %s1112_s22  ;;  %p1118_p13 = scmp.lt.s32.totalorder %s1112_s22, %s1112_s22 }
  0x1c   :  { %p1119_p0 = por %p1118_p13, %p1117_p12 }
  0x1e   :  { %p1120_p1 = pnand %p1119_p0, %p1113_p11 }
  0x20   :  { %1123 = shalt.err (!%p1120_p1)
}
  0x21   :  { %s1176_s1 = smov 128   ;;  %s1177_s23 = smov 8  }
  0x22   :  { %26 = dma.hbm_to_vmem [thread:$0]  %s1863_s0, 1024, %s1220_s27, [#allocation3], %s1176_s1, %s1176_s1, %s1177_s23  }
  0x23   :  { %s1178_s26 = smov [#allocation7]   ;;  %s1124_s8 = scalar_lea.hbm %s1866_s3, 2048 }
  0x24   :  { %s44_s28 = sshll.u32 %s1178_s26, 4  ;;  %p1125_p2 = scmp.ne.s32.totalorder %s1866_s3, %s1124_s8  ;;  %s45_s28 = int_to_ptr.vmem [resolvable:$true] %s44_s28 }
  0x25   :  { %p1128_p3 = scmp.lt.u32.totalorder %s1124_s8, %s1866_s3 }
  0x27   :  { %p1130_p4 = pnand %p1128_p3, %p1125_p2 }
  0x29   :  { %1133 = shalt.err (!%p1130_p4)
}
  0x2a   :  { %s1134_s13 = scalar_lea.vmem %s45_s28, 2048  ;;  %p1139_p6 = scmp.lt.s32.totalorder %s45_s28, %s45_s28 }
  0x2b   :  { %p1135_p5 = scmp.ne.s32.totalorder %s45_s28, %s1134_s13  ;;  %p1140_p7 = scmp.lt.s32.totalorder %s1134_s13, %s1134_s13 }
  0x2d   :  { %p1141_p8 = por %p1140_p7, %p1139_p6 }
  0x2f   :  { %p1142_p9 = pnand %p1141_p8, %p1135_p5 }
  0x31   :  { %1145 = shalt.err (!%p1142_p9)
}
  0x32   :  { %50 = dma.hbm_to_vmem [thread:$0]  %s1866_s3, 2048, %s45_s28, [#allocation6], %s1176_s1, %s1176_s1, %s1177_s23  }
  0x33   :  { %1168 = dma.done.wait [#allocation3], 1024  }
  0x34   :  { %1169 = vsyncadd [#allocation3], 4294966272 }
  0x35   :  { %1170 = dma.done.wait [#allocation6], 2176  }
  0x36   :  { %1171 = vsyncadd [#allocation6], 4294965120  ;;  %v74_v0 = vlaneseq  ;;  %v627_v4 = vld [vmem:[#allocation7] sm:$0xff]  ;;  %v628_v5 = vld [vmem:[#allocation7 + $0x8] sm:$0xff] }
  0x37   :  { %v629_v6 = vld [vmem:[#allocation7 + $0x10] sm:$0xff]  ;;  %v1010_v8 = vpack.c.bf16 %v628_v5, %v627_v4  ;;  %v630_v9 = vld [vmem:[#allocation7 + $0x18] sm:$0xff]  ;;  %v631_v10 = vld [vmem:[#allocation7 + $0x20] sm:$0xff] }
  0x38   :  { %v1269_v1 = vshrl.u32 %v74_v0, 7  ;;  %v632_v11 = vld [vmem:[#allocation7 + $0x28] sm:$0xff]  ;;  %v1014_v14 = vpack.c.bf16 %v630_v9, %v629_v6  ;;  %v633_v15 = vld [vmem:[#allocation7 + $0x30] sm:$0xff]  ;;  %v634_v16 = vld [vmem:[#allocation7 + $0x38] sm:$0xff] }
  0x39   :  { %v635_v17 = vld [vmem:[#allocation7 + $0x40] sm:$0xff]  ;;  %1011 = vmatprep.subr.bf16.mxu0 %v1010_v8  ;;  %1042 = vmatprep.subr.bf16.mxu1 %v1010_v8  ;;  %v636_v21 = vld [vmem:[#allocation7 + $0x48] sm:$0xff]  ;;  %v637_v22 = vld [vmem:[#allocation7 + $0x50] sm:$0xff]  ;;  %v1018_v24 = vpack.c.bf16 %v632_v11, %v631_v10  ;;  %v1293_v28 = vpack.c.bf16 %v634_v16, %v633_v15 }
  0x3a   :  { %v79_v2 = vadd.s32 32, %v1269_v1  ;;  %v1273_v3 = vand.u32 15, %v1269_v1  ;;  %vm195_vm0 = vcmp.lt.s32.totalorder %v1269_v1, 3  ;;  %vm265_vm1 = vcmp.lt.s32.totalorder %v1269_v1, 2  ;;  %v638_v23 = vld [vmem:[#allocation7 + $0x58] sm:$0xff]  ;;  %1013 = vmatpush3.bf16.msra.mxu0 %v1010_v8  ;;  %1050 = vmatpush3.bf16.msra.mxu1 %v1010_v8  ;;  %v639_v25 = vld [vmem:[#allocation7 + $0x60] sm:$0xff] }
  0x3b   :  { %v76_v7 = vadd.s32 8, %v1269_v1  ;;  %vm335_vm2 = vcmp.lt.s32.totalorder %v1269_v1, 1  ;;  %v80_v13 = vadd.s32 40, %v1269_v1  ;;  %v77_v18 = vadd.s32 16, %v1269_v1  ;;  %v640_v26 = vld [vmem:[#allocation7 + $0x68] sm:$0xff]  ;;  %1015 = vmatprep.subr.bf16.mxu0 %v1014_v14  ;;  %1043 = vmatprep.subr.bf16.mxu1 %v1014_v14  ;;  %v641_v31 = vld [vmem:[#allocation7 + $0x70] sm:$0xff] }
  0x3c   :  { %v1279_v12 = vand.u32 15, %v79_v2  ;;  %v78_v19 = vadd.s32 24, %v1269_v1  ;;  %v81_v20 = vadd.s32 48, %v1269_v1  ;;  %vm204_vm3 = vcmp.ge.s32.totalorder %v1273_v3, 3  ;;  %v642_v32 = vld [vmem:[#allocation7 + $0x78] sm:$0xff]  ;;  %v1304_v35 = vld [vmem:[#allocation2 + $0x8] sm:$0xff] }
  0x3d   :  { %vm426_vm4 = vcmp.lt.s32.totalorder %v1269_v1, 7  ;;  %vm496_vm5 = vcmp.lt.s32.totalorder %v1269_v1, 6  ;;  %vm274_vm6 = vcmp.ge.s32.totalorder %v1273_v3, 2  ;;  %vm344_vm7 = vcmp.ge.s32.totalorder %v1273_v3, 1  ;;  %v1299_v33 = vld [vmem:[#allocation2] sm:$0xff]  ;;  %v1306_v36 = vld [vmem:[#allocation2 + $0x38] sm:$0xff] }
  0x3e   :  { %vm566_vm8 = vcmp.lt.s32.totalorder %v1269_v1, 5  ;;  %v1291_v27 = vand.u32 15, %v76_v7  ;;  %v1295_v29 = vpack.c.bf16 %v636_v21, %v635_v17  ;;  %v1297_v30 = vpack.c.bf16 %v638_v23, %v637_v22  ;;  %v1316_v41 = vld [vmem:[#allocation5] ss:$0 sm:$0xff]  ;;  %1017 = vmatpush3.bf16.msra.mxu0 %v1014_v14  ;;  %1051 = vmatpush3.bf16.msra.mxu1 %v1014_v14  ;;  %v1331_v49 = vld [vmem:[#allocation5 + $0x1] ss:$0 sm:$0xff] }
  0x3f   :  { %vm208_vm9 = vcmp.ge.s32.totalorder %v1279_v12, 3  ;;  %v1302_v34 = vand.u32 15, %v80_v13  ;;  %v187_v37 = vrot.slane %v1299_v33, 5  ;;  %vm278_vm10 = vcmp.ge.s32.totalorder %v1279_v12, 2  ;;  %v1329_v48 = vld [vmem:[%s1865_s2] ss:$0 sm:$0xff]  ;;  %1019 = vmatprep.subr.bf16.mxu0 %v1018_v24  ;;  %1044 = vmatprep.subr.bf16.mxu1 %v1018_v24 }
  0x40   :  { %v1310_v38 = vand.u32 15, %v77_v18  ;;  %v1312_v39 = vand.u32 15, %v78_v19  ;;  %v1314_v40 = vand.u32 15, %v81_v20  ;;  %v194_v42 = vrot.slane %v1306_v36, 5  ;;  %v1334_v51 = vld [vmem:[#allocation5 + $0x3] ss:$0 sm:$0xff] }
  0x41   :  { %v257_v43 = vrot.slane %v1299_v33, 6  ;;  %v264_v44 = vrot.slane %v1306_v36, 6  ;;  %v327_v45 = vrot.slane %v1299_v33, 7  ;;  %v1322_v46 = vpack.c.bf16 %v640_v26, %v639_v25  ;;  %v1350_v55 = vld [vmem:[#allocation5 + $0x2] ss:$0 sm:$0xff]  ;;  %v1368_v63 = vld [vmem:[#allocation2 + $0x18] sm:$0xff] }
  0x42   :  { %v1324_v47 = vpack.c.bf16 %v642_v32, %v641_v31  ;;  %v334_v50 = vrot.slane %v1306_v36, 7  ;;  %v418_v52 = vrot.slane %v1299_v33, 1  ;;  %vm348_vm11 = vcmp.ge.s32.totalorder %v1279_v12, 1  ;;  %v1354_v57 = vld [vmem:[#allocation5 + $0x4] ss:$0 sm:$0xff]  ;;  %1021 = vmatpush3.bf16.msra.mxu0 %v1018_v24  ;;  %1052 = vmatpush3.bf16.msra.mxu1 %v1018_v24 }
  0x43   :  { %v203_v53 = vsel %vm195_vm0, %v194_v42, %v187_v37  ;;  %v273_v54 = vsel %vm265_vm1, %v264_v44, %v257_v43  ;;  %v401_v56 = vmul.f32 %v1334_v51, %v1299_v33  ;;  %v419_v58 = vrot.slane %v1304_v35, 1  ;;  %v1370_v0 = vld [vmem:[#allocation2 + $0x20] sm:$0xff]  ;;  %1023 = vmatprep.subr.bf16.mxu0 %v1293_v28  ;;  %1045 = vmatprep.subr.bf16.mxu1 %v1293_v28 }
  0x44   :  { %v228_v59 = vsel %vm204_vm3, %v203_v53, 0.0  ;;  %v298_v60 = vsel %vm274_vm6, %v273_v54, 0.0  ;;  %v343_v61 = vsel %vm335_vm2, %v334_v50, %v327_v45  ;;  %v488_v62 = vrot.slane %v1299_v33, 2  ;;  %v1384_v9 = vld [vmem:[#allocation5 + $0x5] ss:$0 sm:$0xff]  ;;  %v1433_v53 = vld [vmem:[#allocation2 + $0x28] sm:$0xff] }
  0x45   :  { %v240_v2 = vmul.f32 %v1316_v41, %v228_v59  ;;  %v310_v4 = vmul.f32 %v1331_v49, %v298_v60  ;;  %v368_v5 = vsel %vm344_vm7, %v343_v61, 0.0  ;;  %v433_v6 = vsel %vm426_vm4, %v418_v52, %v419_v58  ;;  %v1391_v13 = vld [vmem:[#allocation5 + $0x6] ss:$0 sm:$0xff] }
  0x46   :  { %v380_v7 = vmul.f32 %v1350_v55, %v368_v5  ;;  %v471_v8 = vmul.f32 %v1354_v57, %v433_v6  ;;  %v489_v10 = vrot.slane %v1304_v35, 2  ;;  %v1871_v3 = vrot.slane %v1299_v33, 3  ;;  %1025 = vmatpush3.bf16.msra.mxu0 %v1293_v28  ;;  %1053 = vmatpush3.bf16.msra.mxu1 %v1293_v28 }
  0x47   :  { %v248_v11 = vadd.f32 %v1329_v48, %v240_v2  ;;  %v559_v14 = vrot.slane %v1304_v35, 3  ;;  %v190_v15 = vrot.slane %v1368_v63, 5  ;;  %v191_v16 = vrot.slane %v1370_v0, 5  ;;  %1027 = vmatprep.subr.bf16.mxu0 %v1295_v29  ;;  %1046 = vmatprep.subr.bf16.mxu1 %v1295_v29 }
  0x48   :  { %v503_v17 = vsel %vm496_vm5, %v488_v62, %v489_v10  ;;  %v260_v18 = vrot.slane %v1368_v63, 6  ;;  %v261_v19 = vrot.slane %v1370_v0, 6  ;;  %v330_v20 = vrot.slane %v1368_v63, 7 }
  0x49   :  { %v318_v21 = vadd.f32 %v310_v4, %v248_v11  ;;  %v541_v22 = vmul.f32 %v1384_v9, %v503_v17  ;;  %v573_v23 = vsel %vm566_vm8, %v1871_v3, %v559_v14  ;;  %v199_v24 = vsel %vm195_vm0, %v190_v15, %v191_v16 }
  0x4a   :  { %v611_v25 = vmul.f32 %v1391_v13, %v573_v23  ;;  %v232_v26 = vsel %vm208_vm9, %v199_v24, 0.0  ;;  %v269_v31 = vsel %vm265_vm1, %v260_v18, %v261_v19  ;;  %v331_v32 = vrot.slane %v1370_v0, 7  ;;  %1029 = vmatpush3.bf16.msra.mxu0 %v1295_v29  ;;  %1054 = vmatpush3.bf16.msra.mxu1 %v1295_v29 }
  0x4b   :  { %vm436_vm12 = vcmp.lt.s32.totalorder %v1291_v27, 15  ;;  %v388_v28 = vadd.f32 %v380_v7, %v318_v21  ;;  %v244_v54 = vmul.f32 %v1316_v41, %v232_v26  ;;  %v302_v59 = vsel %vm278_vm10, %v269_v31, 0.0  ;;  %1031 = vmatprep.subr.bf16.mxu0 %v1297_v30  ;;  %1047 = vmatprep.subr.bf16.mxu1 %v1297_v30 }
  0x4c   :  { %v405_v60 = vmul.f32 %v1334_v51, %v1370_v0  ;;  %v314_v61 = vmul.f32 %v1331_v49, %v302_v59  ;;  %v339_v2 = vsel %vm335_vm2, %v330_v20, %v331_v32  ;;  %v422_v4 = vrot.slane %v1370_v0, 1 }
  0x4d   :  { %v423_v5 = vrot.slane %v1433_v53, 1  ;;  %vm506_vm13 = vcmp.lt.s32.totalorder %v1291_v27, 14  ;;  %v409_v6 = vadd.f32 %v401_v56, %v388_v28  ;;  %v252_v7 = vadd.f32 %v1329_v48, %v244_v54  ;;  %v1470_v28 = vld [vmem:[#allocation2 + $0x10] sm:$0xff] }
  0x4e   :  { %v372_v11 = vsel %vm348_vm11, %v339_v2, 0.0  ;;  %v492_v17 = vrot.slane %v1370_v0, 2  ;;  %v493_v23 = vrot.slane %v1433_v53, 2  ;;  %v562_v12 = vrot.slane %v1370_v0, 3  ;;  %1033 = vmatpush3.bf16.msra.mxu0 %v1297_v30  ;;  %1055 = vmatpush3.bf16.msra.mxu1 %v1297_v30 }
  0x4f   :  { %v384_v21 = vmul.f32 %v1350_v55, %v372_v11  ;;  %v429_v56 = vsel %vm426_vm4, %v422_v4, %v423_v5  ;;  %vm576_vm14 = vcmp.lt.s32.totalorder %v1291_v27, 13  ;;  %v479_v29 = vadd.f32 %v471_v8, %v409_v6  ;;  %1035 = vmatprep.subr.bf16.mxu0 %v1322_v46  ;;  %1048 = vmatprep.subr.bf16.mxu1 %v1322_v46 }
  0x50   :  { %v322_v24 = vadd.f32 %v314_v61, %v252_v7  ;;  %v475_v26 = vmul.f32 %v1354_v57, %v429_v56  ;;  %v563_v31 = vrot.slane %v1433_v53, 3  ;;  %v499_v54 = vsel %vm496_vm5, %v492_v17, %v493_v23 }
  0x51   :  { %v188_v59 = vrot.slane %v1304_v35, 5  ;;  %v258_v2 = vrot.slane %v1304_v35, 6  ;;  %v328_v8 = vrot.slane %v1304_v35, 7  ;;  %v549_v61 = vadd.f32 %v541_v22, %v479_v29 }
  0x52   :  { %v392_v6 = vadd.f32 %v384_v21, %v322_v24  ;;  %v545_v7 = vmul.f32 %v1384_v9, %v499_v54  ;;  %v569_v11 = vsel %vm566_vm8, %v562_v12, %v563_v31  ;;  %v420_v29 = vrot.slane %v1470_v28, 1  ;;  %1037 = vmatpush3.bf16.msra.mxu0 %v1322_v46  ;;  %1056 = vmatpush3.bf16.msra.mxu1 %v1322_v46 }
  0x53   :  { %v615_v56 = vmul.f32 %v1391_v13, %v569_v11  ;;  %v202_v22 = vsel %vm195_vm0, %v187_v37, %v188_v59  ;;  %v272_v21 = vsel %vm265_vm1, %v257_v43, %v258_v2  ;;  %v619_v30 = vadd.f32 %v611_v25, %v549_v61  ;;  %1039 = vmatprep.subr.bf16.mxu0 %v1324_v47 }
  0x54   :  { %v413_v24 = vadd.f32 %v405_v60, %v392_v6  ;;  %v241_v54 = vmul.f32 %v1316_v41, %v202_v22  ;;  %v490_v11 = vrot.slane %v1470_v28, 2  ;;  %v311_v37 = vmul.f32 %v1331_v49, %v272_v21  ;;  %1049 = vmatprep.subr.bf16.mxu1 %v1324_v47 }
  0x55   :  { %v342_v43 = vsel %vm335_vm2, %v327_v45, %v328_v8  ;;  %v402_v3 = vmul.f32 %v1334_v51, %v1304_v35  ;;  %v432_v25 = vsel %vm426_vm4, %v419_v58, %v420_v29  ;;  %998 = vmatprep.mubr.f32.mxu0 %v619_v30  ;;  %v192_v21 = vrot.slane %v1433_v53, 5 }
  0x56   :  { %v483_v60 = vadd.f32 %v475_v26, %v413_v24  ;;  %v249_v61 = vadd.f32 %v1329_v48, %v241_v54  ;;  %v381_v6 = vmul.f32 %v1350_v55, %v342_v43  ;;  %v460_v22 = vsel %vm436_vm12, %v432_v25, 0.0  ;;  %v1542_v54 = vld [vmem:[#allocation2 + $0x30] sm:$0xff]  ;;  %1041 = vmatpush3.bf16.msra.mxu0 %v1324_v47  ;;  %1057 = vmatpush3.bf16.msra.mxu1 %v1324_v47 }
  0x57   :  { %v472_v45 = vmul.f32 %v1354_v57, %v460_v22  ;;  %v502_v58 = vsel %vm496_vm5, %v489_v10, %v490_v11  ;;  %v560_v26 = vrot.slane %v1470_v28, 3  ;;  %v262_v43 = vrot.slane %v1433_v53, 6 }
  0x58   :  { %v553_v30 = vadd.f32 %v545_v7, %v483_v60  ;;  %v319_v24 = vadd.f32 %v311_v37, %v249_v61  ;;  %v530_v46 = vsel %vm506_vm13, %v502_v58, 0.0  ;;  %v198_v7 = vsel %vm195_vm0, %v191_v16, %v192_v21 }
  0x59   :  { %v542_v25 = vmul.f32 %v1384_v9, %v530_v46  ;;  %v572_v10 = vsel %vm566_vm8, %v559_v14, %v560_v26  ;;  %v332_v37 = vrot.slane %v1433_v53, 7  ;;  %v245_v58 = vmul.f32 %v1316_v41, %v198_v7 }
  0x5a   :  { %v623_v60 = vadd.f32 %v615_v56, %v553_v30  ;;  %v389_v61 = vadd.f32 %v381_v6, %v319_v24  ;;  %v600_v22 = vsel %vm576_vm14, %v572_v10, 0.0  ;;  %v268_v16 = vsel %vm265_vm1, %v261_v19, %v262_v43 }
  0x5b   :  { %v612_v14 = vmul.f32 %v1391_v13, %v600_v22  ;;  %v338_v27 = vsel %vm335_vm2, %v331_v32, %v332_v37  ;;  %v424_v56 = vrot.slane %v1542_v54, 1  ;;  %v253_v6 = vadd.f32 %v1329_v48, %v245_v58 }
  0x5c   :  { %1004 = vmatprep.mubr.f32.mxu1 %v623_v60  ;;  %v410_v47 = vadd.f32 %v402_v3, %v389_v61  ;;  %v315_v30 = vmul.f32 %v1331_v49, %v268_v16  ;;  %v385_v24 = vmul.f32 %v1350_v55, %v338_v27  ;;  %v406_v19 = vmul.f32 %v1334_v51, %v1433_v53 }
  0x5d   :  { %v428_v32 = vsel %vm426_vm4, %v423_v5, %v424_v56  ;;  %vm440_vm15 = vcmp.lt.s32.totalorder %v1302_v34, 15  ;;  %v494_v3 = vrot.slane %v1542_v54, 2  ;;  %vm510_vm3 = vcmp.lt.s32.totalorder %v1302_v34, 14 }
  0x5e   :  { %v480_v46 = vadd.f32 %v472_v45, %v410_v47  ;;  %v323_v10 = vadd.f32 %v315_v30, %v253_v6  ;;  %v464_v7 = vsel %vm440_vm15, %v428_v32, 0.0  ;;  %v564_v5 = vrot.slane %v1542_v54, 3 }
  0x5f   :  { %v476_v60 = vmul.f32 %v1354_v57, %v464_v7  ;;  %v498_v61 = vsel %vm496_vm5, %v493_v23, %v494_v3  ;;  %vm580_vm6 = vcmp.lt.s32.totalorder %v1302_v34, 13  ;;  %v189_v16 = vrot.slane %v1470_v28, 5 }
  0x60   :  { %v550_v22 = vadd.f32 %v542_v25, %v480_v46  ;;  %v393_v58 = vadd.f32 %v385_v24, %v323_v10  ;;  %v534_v45 = vsel %vm510_vm3, %v498_v61, 0.0  ;;  %v568_v47 = vsel %vm566_vm8, %v563_v31, %v564_v5 }
  0x61   :  { %v546_v27 = vmul.f32 %v1384_v9, %v534_v45  ;;  %vm206_vm7 = vcmp.ge.s32.totalorder %v1310_v38, 3  ;;  %v259_v23 = vrot.slane %v1470_v28, 6  ;;  %v604_v25 = vsel %vm580_vm6, %v568_v47, 0.0 }
  0x62   :  { %v620_v6 = vadd.f32 %v612_v14, %v550_v22  ;;  %v414_v34 = vadd.f32 %v406_v19, %v393_v58  ;;  %v201_v30 = vsel %vm195_vm0, %v188_v59, %v189_v16  ;;  %v616_v24 = vmul.f32 %v1391_v13, %v604_v25 }
  0x63   :  { %v230_v32 = vsel %vm206_vm7, %v201_v30, 0.0  ;;  %v271_v31 = vsel %vm265_vm1, %v258_v2, %v259_v23  ;;  %vm276_vm9 = vcmp.ge.s32.totalorder %v1310_v38, 2  ;;  %v329_v10 = vrot.slane %v1470_v28, 7 }
  0x64   :  { %999 = vmatmul.mubr.f32.vlgmr.msra.gmra.mrb[0].mxu0 %v620_v6  ;;  %v484_v46 = vadd.f32 %v476_v60, %v414_v34  ;;  %v242_v14 = vmul.f32 %v1316_v41, %v230_v32  ;;  %v300_v19 = vsel %vm276_vm9, %v271_v31, 0.0  ;;  %vm346_vm10 = vcmp.ge.s32.totalorder %v1310_v38, 1 }
  0x65   :  { %v312_v7 = vmul.f32 %v1331_v49, %v300_v19  ;;  %v403_v59 = vmul.f32 %v1334_v51, %v1470_v28  ;;  %v421_v61 = vrot.slane %v1368_v63, 1  ;;  %v341_v60 = vsel %vm335_vm2, %v328_v8, %v329_v10 }
  0x66   :  { %v554_v22 = vadd.f32 %v546_v27, %v484_v46  ;;  %v250_v2 = vadd.f32 %v1329_v48, %v242_v14  ;;  %v491_v58 = vrot.slane %v1368_v63, 2  ;;  %v370_v45 = vsel %vm346_vm10, %v341_v60, 0.0 }
  0x67   :  { %v431_v38 = vsel %vm426_vm4, %v420_v29, %v421_v61  ;;  %v561_v47 = vrot.slane %v1368_v63, 3  ;;  %v200_v27 = vsel %vm195_vm0, %v189_v16, %v190_v15  ;;  %v382_v25 = vmul.f32 %v1350_v55, %v370_v45 }
  0x68   :  { %v624_v6 = vadd.f32 %v616_v24, %v554_v22  ;;  %v320_v34 = vadd.f32 %v312_v7, %v250_v2  ;;  %v473_v8 = vmul.f32 %v1354_v57, %v431_v38  ;;  %v501_v30 = vsel %vm496_vm5, %v490_v11, %v491_v58 }
  0x69   :  { %v571_v29 = vsel %vm566_vm8, %v560_v26, %v561_v47  ;;  %v243_v32 = vmul.f32 %v1316_v41, %v200_v27  ;;  %v270_v15 = vsel %vm265_vm1, %v259_v23, %v260_v18  ;;  %v543_v24 = vmul.f32 %v1384_v9, %v501_v30 }
  0x6a   :  { %1005 = vmatmul.mubr.f32.vlgmr.msra.gmra.mrb[0].mxu1 %v624_v6  ;;  %v390_v16 = vadd.f32 %v382_v25, %v320_v34  ;;  %v613_v31 = vmul.f32 %v1391_v13, %v571_v29  ;;  %v313_v11 = vmul.f32 %v1331_v49, %v270_v15  ;;  %v340_v26 = vsel %vm335_vm2, %v329_v10, %v330_v20 }
  0x6b   :  { %v251_v46 = vadd.f32 %v1329_v48, %v243_v32  ;;  %v404_v14 = vmul.f32 %v1334_v51, %v1368_v63  ;;  %v430_v18 = vsel %vm426_vm4, %v421_v61, %v422_v4  ;;  %v383_v19 = vmul.f32 %v1350_v55, %v340_v26 }
  0x6c   :  { %v411_v23 = vadd.f32 %v403_v59, %v390_v16  ;;  %vm438_vm11 = vcmp.lt.s32.totalorder %v1312_v39, 15  ;;  %v500_v7 = vsel %vm496_vm5, %v491_v58, %v492_v17  ;;  %vm508_vm12 = vcmp.lt.s32.totalorder %v1312_v39, 14 }
  0x6d   :  { %v321_v22 = vadd.f32 %v313_v11, %v251_v46  ;;  %v462_v20 = vsel %vm438_vm11, %v430_v18, 0.0  ;;  %v570_v10 = vsel %vm566_vm8, %v561_v47, %v562_v12  ;;  %v532_v61 = vsel %vm508_vm12, %v500_v7, 0.0 }
  0x6e   :  { %v481_v4 = vadd.f32 %v473_v8, %v411_v23  ;;  %v474_v59 = vmul.f32 %v1354_v57, %v462_v20  ;;  %vm578_vm13 = vcmp.lt.s32.totalorder %v1312_v39, 13  ;;  %v544_v60 = vmul.f32 %v1384_v9, %v532_v61 }
  0x6f   :  { %v391_v2 = vadd.f32 %v383_v19, %v321_v22  ;;  %v602_v45 = vsel %vm578_vm13, %v570_v10, 0.0  ;;  %v193_v17 = vrot.slane %v1542_v54, 5  ;;  %vm210_vm14 = vcmp.ge.s32.totalorder %v1314_v40, 3 }
  0x70   :  { %v551_v58 = vadd.f32 %v543_v24, %v481_v4  ;;  %v614_v38 = vmul.f32 %v1391_v13, %v602_v45  ;;  %v263_v27 = vrot.slane %v1542_v54, 6  ;;  %vm280_vm15 = vcmp.ge.s32.totalorder %v1314_v40, 2 }
  0x71   :  { %v412_v12 = vadd.f32 %v404_v14, %v391_v2  ;;  %v197_v47 = vsel %vm195_vm0, %v192_v21, %v193_v17  ;;  %v333_v39 = vrot.slane %v1542_v54, 7  ;;  %vm350_vm3 = vcmp.ge.s32.totalorder %v1314_v40, 1 }
  0x72   :  { %v621_v6 = vadd.f32 %v613_v31, %v551_v58  ;;  %v234_v34 = vsel %vm210_vm14, %v197_v47, 0.0  ;;  %v267_v25 = vsel %vm265_vm1, %v262_v43, %v263_v27  ;;  %v425_v16 = vrot.slane %v1306_v36, 1 }
  0x73   :  { %v482_v8 = vadd.f32 %v474_v59, %v412_v12  ;;  %v246_v30 = vmul.f32 %v1316_v41, %v234_v34  ;;  %v304_v29 = vsel %vm280_vm15, %v267_v25, 0.0  ;;  %v337_v21 = vsel %vm335_vm2, %v332_v37, %v333_v39  ;;  %v939_v25 = vld [vmem:[%s1867_s4] ss:$0 sm:$0xff] }
  0x74   :  { %1001 = vmatprep.mubr.f32.mxu0 %v621_v6  ;;  %v316_v32 = vmul.f32 %v1331_v49, %v304_v29  ;;  %v374_v15 = vsel %vm350_vm3, %v337_v21, 0.0  ;;  %v495_v31 = vrot.slane %v1306_v36, 2  ;;  %v427_v11 = vsel %vm426_vm4, %v424_v56, %v425_v16 }
  0x75   :  { %v552_v24 = vadd.f32 %v544_v60, %v482_v8  ;;  %v254_v43 = vadd.f32 %v1329_v48, %v246_v30  ;;  %v386_v40 = vmul.f32 %v1350_v55, %v374_v15  ;;  %v565_v37 = vrot.slane %v1306_v36, 3 }
  0x76   :  { %v82_v46 = vadd.s32 56, %v1269_v1  ;;  %v196_v26 = vsel %vm195_vm0, %v193_v17, %v194_v42  ;;  %v407_v23 = vmul.f32 %v1334_v51, %v1542_v54  ;;  %v497_v19 = vsel %vm496_vm5, %v494_v3, %v495_v31 }
  0x77   :  { %v622_v14 = vadd.f32 %v614_v38, %v552_v24  ;;  %v324_v18 = vadd.f32 %v316_v32, %v254_v43  ;;  %v477_v56 = vmul.f32 %v1354_v57, %v427_v11  ;;  %v547_v7 = vmul.f32 %v1384_v9, %v497_v19 }
  0x78   :  { %v136_v22 = vand.u32 15, %v82_v46  ;;  %v247_v20 = vmul.f32 %v1316_v41, %v196_v26  ;;  %v567_v42 = vsel %vm566_vm8, %v564_v5, %v565_v37  ;;  %v266_v4 = vsel %vm265_vm1, %v263_v27, %v264_v44 }
  0x79   :  { %1002 = vmatmul.mubr.f32.gmra.mrb[2].mxu0 %v622_v14  ;;  %v394_v10 = vadd.f32 %v386_v40, %v324_v18  ;;  %v336_v3 = vsel %vm335_vm2, %v333_v39, %v334_v50  ;;  %v317_v41 = vmul.f32 %v1331_v49, %v266_v4  ;;  %v408_v2 = vmul.f32 %v1334_v51, %v1306_v36 }
  0x7a   :  { %v255_v59 = vadd.f32 %v1329_v48, %v247_v20  ;;  %v387_v61 = vmul.f32 %v1350_v55, %v336_v3  ;;  %v434_v44 = vsel %vm426_vm4, %v425_v16, %v418_v52  ;;  %vm442_vm0 = vcmp.lt.s32.totalorder %v136_v22, 15 }
  0x7b   :  { %v415_v5 = vadd.f32 %v407_v23, %v394_v10  ;;  %v504_v50 = vsel %vm496_vm5, %v495_v31, %v488_v62  ;;  %v466_v60 = vsel %vm442_vm0, %v434_v44, 0.0  ;;  %vm512_vm1 = vcmp.lt.s32.totalorder %v136_v22, 14 }
  0x7c   :  { %v325_v48 = vadd.f32 %v317_v41, %v255_v59  ;;  %v1872_v49 = vrot.slane %v1299_v33, 3  ;;  %v617_v45 = vmul.f32 %v1391_v13, %v567_v42  ;;  %v536_v17 = vsel %vm512_vm1, %v504_v50, 0.0 }
  0x7d   :  { %v485_v55 = vadd.f32 %v477_v56, %v415_v5  ;;  %vm582_vm2 = vcmp.lt.s32.totalorder %v136_v22, 13  ;;  %v478_v58 = vmul.f32 %v1354_v57, %v466_v60  ;;  %v548_v62 = vmul.f32 %v1384_v9, %v536_v17 }
  0x7e   :  { %v574_v51 = vsel %vm566_vm8, %v565_v37, %v1872_v49  ;;  %v395_v52 = vadd.f32 %v387_v61, %v325_v48 }
  0x7f   :  { %v555_v38 = vadd.f32 %v547_v7, %v485_v55  ;;  %v606_v27 = vsel %vm582_vm2, %v574_v51, 0.0 }
  0x80   :  { %v416_v12 = vadd.f32 %v408_v2, %v395_v52  ;;  %v618_v6 = vmul.f32 %v1391_v13, %v606_v27 }
  0x81   :  { %v625_v47 = vadd.f32 %v617_v45, %v555_v38 }
  0x82   :  { %v486_v39 = vadd.f32 %v478_v58, %v416_v12 }
  0x83   :  { %1007 = vmatprep.mubr.f32.mxu1 %v625_v47 }
  0x84   :  { %v556_v1 = vadd.f32 %v548_v62, %v486_v39 }
  0x86   :  { %v626_v34 = vadd.f32 %v618_v6, %v556_v1 }
  0x88   :  { %1008 = vmatmul.mubr.f32.gmra.mrb[2].mxu1 %v626_v34 }
 0x137   :  { %v1000_v8 = vpop.f32.mrb[0].mxu0 }
 0x138   :  { %v722_v30 = vadd.f32 %v1000_v8, %v939_v25  ;;  %v716_v57 = vpop.f32.mrb[1].mxu0 }
 0x139   :  { %v717_v29 = vadd.f32 %v939_v25, %v716_v57 }
 0x13a   :  { %v756_v21 = vmax.f32 %v722_v30, 0.0 }
 0x13b   :  { %v755_v9 = vmax.f32 %v717_v29, 0.0 }
 0x13c   :  { %v1767_v32 = vadd.f32 %v756_v21, %v1304_v35 }
 0x13d   :  { %v1006_v15 = vpop.f32.mrb[0].mxu1  ;;  %v1771_v40 = vadd.f32 %v755_v9, %v1299_v33 }
 0x13e   :  { %v742_v16 = vadd.f32 %v1006_v15, %v939_v25  ;;  %v736_v13 = vpop.f32.mrb[1].mxu1  ;;  %773 = vadd.xlane.f32.xlu0 %v1767_v32  ;;  %v788_v37 = vmul.f32 %v1767_v32, %v1767_v32  ;;  %v1818_v15 = vld [vmem:[%s1868_s5] ss:$0 sm:$0xff]  ;;  %s1179_s5 = smov [#allocation8]  }
 0x13f   :  { %v737_v24 = vadd.f32 %v939_v25, %v736_v13  ;;  %v787_v33 = vmul.f32 %v1771_v40, %v1771_v40 }
 0x140   :  { %v760_v43 = vmax.f32 %v742_v16, 0.0 }
 0x141   :  { %v759_v31 = vmax.f32 %v737_v24, 0.0 }
 0x142   :  { %v1774_v11 = vadd.f32 %v760_v43, %v1433_v53  ;;  %771 = vadd.xlane.f32.xlu0 %v1771_v40  ;;  %v1824_v43 = vld [vmem:[%s1869_s6] ss:$0 sm:$0xff]  ;;  %s918_s6 = sshll.u32 %s1179_s5, 4  ;;  %s919_s6 = int_to_ptr.vmem [resolvable:$true] %s918_s6 }
 0x143   :  { %v1778_v35 = vadd.f32 %v759_v31, %v1370_v0  ;;  %s1146_s19 = scalar_lea.vmem %s919_s6, 1024  ;;  %p1151_p11 = scmp.lt.s32.totalorder %s919_s6, %s919_s6 }
 0x144   :  { %781 = vadd.xlane.f32.xlu1 %v1774_v11  ;;  %v792_v53 = vmul.f32 %v1774_v11, %v1774_v11  ;;  %p1147_p10 = scmp.ne.s32.totalorder %s919_s6, %s1146_s19  ;;  %p1152_p12 = scmp.lt.s32.totalorder %s1146_s19, %s1146_s19 }
 0x145   :  { %v791_v0 = vmul.f32 %v1778_v35, %v1778_v35 }
 0x146   :  { %779 = vadd.xlane.f32.xlu0 %v1778_v35  ;;  %p1153_p13 = por %p1152_p12, %p1151_p11 }
 0x148   :  { %797 = vadd.xlane.f32.xlu1 %v788_v37  ;;  %p1154_p0 = pnand %p1153_p13, %p1147_p10 }
 0x14a   :  { %795 = vadd.xlane.f32.xlu0 %v787_v33 }
 0x14c   :  { %v1003_v46 = vpop.f32.mrb[2].mxu0  ;;  %805 = vadd.xlane.f32.xlu1 %v792_v53 }
 0x14d   :  { %v732_v26 = vadd.f32 %v1003_v46, %v939_v25  ;;  %v726_v14 = vpop.f32.mrb[3].mxu0 }
 0x14e   :  { %803 = vadd.xlane.f32.xlu0 %v791_v0  ;;  %v727_v19 = vadd.f32 %v939_v25, %v726_v14 }
 0x14f   :  { %v758_v18 = vmax.f32 %v732_v26, 0.0 }
 0x150   :  { %v757_v20 = vmax.f32 %v727_v19, 0.0 }
 0x151   :  { %v1791_v23 = vadd.f32 %v758_v18, %v1368_v63 }
 0x152   :  { %v1798_v59 = vadd.f32 %v757_v20, %v1470_v28 }
 0x153   :  { %777 = vadd.xlane.f32.xlu1 %v1791_v23 }
 0x154   :  { %v789_v63 = vmul.f32 %v1798_v59, %v1798_v59 }
 0x15b   :  { %v1009_v56 = vpop.f32.mrb[2].mxu1 }
 0x15c   :  { %v752_v7 = vadd.f32 %v1009_v56, %v939_v25  ;;  %v746_v22 = vpop.f32.mrb[3].mxu1 }
 0x15d   :  { %v747_v10 = vadd.f32 %v939_v25, %v746_v22 }
 0x15e   :  { %v762_v42 = vmax.f32 %v752_v7, 0.0 }
 0x15f   :  { %v761_v4 = vmax.f32 %v747_v10, 0.0 }
 0x160   :  { %v1795_v3 = vadd.f32 %v762_v42, %v1306_v36  ;;  %v790_v36 = vmul.f32 %v1791_v23, %v1791_v23 }
 0x161   :  { %v1801_v41 = vadd.f32 %v761_v4, %v1542_v54 }
 0x162   :  { %785 = vadd.xlane.f32.xlu1 %v1795_v3  ;;  %v794_v54 = vmul.f32 %v1795_v3, %v1795_v3 }
 0x163   :  { %783 = vadd.xlane.f32.xlu0 %v1801_v41  ;;  %v793_v28 = vmul.f32 %v1801_v41, %v1801_v41 }
 0x166   :  { %775 = vadd.xlane.f32.xlu1 %v1798_v59 }
 0x167   :  { %799 = vadd.xlane.f32.xlu0 %v789_v63 }
 0x16a   :  { %801 = vadd.xlane.f32.xlu1 %v790_v36 }
 0x16b   :  { %807 = vadd.xlane.f32.xlu0 %v793_v28 }
 0x16e   :  { %809 = vadd.xlane.f32.xlu1 %v794_v54 }
 0x1cb   :  { %v774_v61 = vpop.xlane.xlu0 %773 }
 0x1cc   :  { %v812_v44 = vmul.f32 0.0078125, %v774_v61 }
 0x1ce   :  { %v828_v51 = vmul.f32 %v812_v44, %v812_v44  ;;  %v844_v21 = vsub.f32 %v1767_v32, %v812_v44 }
 0x1cf   :  { %v772_v2 = vpop.xlane.xlu0 %771 }
 0x1d0   :  { %v811_v48 = vmul.f32 0.0078125, %v772_v2 }
 0x1d1   :  { %v782_v5 = vpop.xlane.xlu1 %781 }
 0x1d2   :  { %v816_v49 = vmul.f32 0.0078125, %v782_v5  ;;  %v827_v58 = vmul.f32 %v811_v48, %v811_v48  ;;  %v843_v13 = vsub.f32 %v1771_v40, %v811_v48 }
 0x1d3   :  { %v780_v50 = vpop.xlane.xlu0 %779 }
 0x1d4   :  { %v815_v45 = vmul.f32 0.0078125, %v780_v50  ;;  %v832_v12 = vmul.f32 %v816_v49, %v816_v49  ;;  %v848_v31 = vsub.f32 %v1774_v11, %v816_v49 }
 0x1d5   :  { %v798_v60 = vpop.xlane.xlu1 %797 }
 0x1d6   :  { %v820_v55 = vmul.f32 0.0078125, %v798_v60  ;;  %v831_v6 = vmul.f32 %v815_v45, %v815_v45  ;;  %v847_v26 = vsub.f32 %v1778_v35, %v815_v45 }
 0x1d7   :  { %v796_v17 = vpop.xlane.xlu0 %795 }
 0x1d8   :  { %v836_v52 = vsub.f32 %v820_v55, %v828_v51  ;;  %v819_v38 = vmul.f32 0.0078125, %v796_v17 }
 0x1d9   :  { %v806_v27 = vpop.xlane.xlu1 %805 }
 0x1da   :  { %v852_v62 = vadd.f32 1e-05, %v836_v52  ;;  %v824_v47 = vmul.f32 0.0078125, %v806_v27  ;;  %v835_v39 = vsub.f32 %v819_v38, %v827_v58 }
 0x1db   :  { %v804_v1 = vpop.xlane.xlu0 %803 }
 0x1dc   :  { %1064 = vrsqrt.f32 %v852_v62  ;;  %v840_v34 = vsub.f32 %v824_v47, %v832_v12  ;;  %v851_v25 = vadd.f32 1e-05, %v835_v39  ;;  %v823_v8 = vmul.f32 0.0078125, %v804_v1 }
 0x1de   :  { %v856_v30 = vadd.f32 1e-05, %v840_v34  ;;  %1066 = vrsqrt.f32 %v851_v25  ;;  %v839_v57 = vsub.f32 %v823_v8, %v831_v6 }
 0x1e0   :  { %1068 = vrsqrt.f32 %v856_v30  ;;  %v855_v29 = vadd.f32 1e-05, %v839_v57  ;;  %v778_v32 = vpop.xlane.xlu1 %777 }
 0x1e1   :  { %v814_v42 = vmul.f32 0.0078125, %v778_v32 }
 0x1e2   :  { %1070 = vrsqrt.f32 %v855_v29 }
 0x1e3   :  { %v830_v2 = vmul.f32 %v814_v42, %v814_v42  ;;  %v846_v6 = vsub.f32 %v1791_v23, %v814_v42 }
 0x1e6   :  { %v1065_v9 = vpop.eup %1064 }
 0x1e7   :  { %v868_v16 = vmul.f32 %v1065_v9, %v844_v21 }
 0x1e8   :  { %v1067_v24 = vpop.eup %1066 }
 0x1e9   :  { %v883_v37 = vmul.f32 %v1818_v15, %v868_v16  ;;  %v867_v33 = vmul.f32 %v1067_v24, %v843_v13 }
 0x1ea   :  { %v1069_v53 = vpop.eup %1068 }
 0x1eb   :  { %v898_v46 = vadd.f32 %v1824_v43, %v883_v37  ;;  %v872_v0 = vmul.f32 %v1069_v53, %v848_v31  ;;  %v882_v40 = vmul.f32 %v1818_v15, %v867_v33 }
 0x1ec   :  { %v1071_v14 = vpop.eup %1070 }
 0x1ed   :  { %906 = vst [vmem:[#allocation8 + $0x8] sm:$0xff] %v898_v46  ;;  %v887_v18 = vmul.f32 %v1818_v15, %v872_v0  ;;  %v897_v19 = vadd.f32 %v1824_v43, %v882_v40  ;;  %v871_v56 = vmul.f32 %v1071_v14, %v847_v26 }
 0x1ef   :  { %v902_v11 = vadd.f32 %v1824_v43, %v887_v18  ;;  %905 = vst [vmem:[#allocation8] sm:$0xff] %v897_v19  ;;  %v786_v7 = vpop.xlane.xlu1 %785  ;;  %v886_v22 = vmul.f32 %v1818_v15, %v871_v56 }
 0x1f0   :  { %v784_v20 = vpop.xlane.xlu0 %783  ;;  %v818_v5 = vmul.f32 0.0078125, %v786_v7 }
 0x1f1   :  { %910 = vst [vmem:[#allocation8 + $0x28] sm:$0xff] %v902_v11  ;;  %v901_v10 = vadd.f32 %v1824_v43, %v886_v22  ;;  %v817_v36 = vmul.f32 0.0078125, %v784_v20 }
 0x1f2   :  { %v834_v52 = vmul.f32 %v818_v5, %v818_v5  ;;  %v850_v21 = vsub.f32 %v1795_v3, %v818_v5 }
 0x1f3   :  { %909 = vst [vmem:[#allocation8 + $0x20] sm:$0xff] %v901_v10  ;;  %v776_v35 = vpop.xlane.xlu1 %775  ;;  %v833_v60 = vmul.f32 %v817_v36, %v817_v36  ;;  %v849_v25 = vsub.f32 %v1801_v41, %v817_v36 }
 0x1f4   :  { %v813_v4 = vmul.f32 0.0078125, %v776_v35  ;;  %v800_v63 = vpop.xlane.xlu0 %799 }
 0x1f5   :  { %v821_v28 = vmul.f32 0.0078125, %v800_v63 }
 0x1f6   :  { %v829_v54 = vmul.f32 %v813_v4, %v813_v4  ;;  %v845_v47 = vsub.f32 %v1798_v59, %v813_v4 }
 0x1f7   :  { %v802_v61 = vpop.xlane.xlu1 %801 }
 0x1f8   :  { %v822_v44 = vmul.f32 0.0078125, %v802_v61  ;;  %v837_v50 = vsub.f32 %v821_v28, %v829_v54  ;;  %v808_v48 = vpop.xlane.xlu0 %807 }
 0x1f9   :  { %v825_v49 = vmul.f32 0.0078125, %v808_v48 }
 0x1fa   :  { %v838_v51 = vsub.f32 %v822_v44, %v830_v2  ;;  %v853_v55 = vadd.f32 1e-05, %v837_v50 }
 0x1fb   :  { %v810_v45 = vpop.xlane.xlu1 %809  ;;  %v841_v17 = vsub.f32 %v825_v49, %v833_v60 }
 0x1fc   :  { %v854_v58 = vadd.f32 1e-05, %v838_v51  ;;  %1072 = vrsqrt.f32 %v853_v55  ;;  %v826_v38 = vmul.f32 0.0078125, %v810_v45 }
 0x1fd   :  { %v857_v27 = vadd.f32 1e-05, %v841_v17 }
 0x1fe   :  { %1074 = vrsqrt.f32 %v854_v58  ;;  %v842_v12 = vsub.f32 %v826_v38, %v834_v52 }
 0x1ff   :  { %1076 = vrsqrt.f32 %v857_v27 }
 0x200   :  { %v858_v62 = vadd.f32 1e-05, %v842_v12 }
 0x202   :  { %1078 = vrsqrt.f32 %v858_v62 }
 0x206   :  { %v1073_v39 = vpop.eup %1072 }
 0x207   :  { %v869_v1 = vmul.f32 %v1073_v39, %v845_v47 }
 0x208   :  { %v1075_v34 = vpop.eup %1074 }
 0x209   :  { %v1077_v8 = vpop.eup %1076  ;;  %v870_v30 = vmul.f32 %v1075_v34, %v846_v6  ;;  %v884_v57 = vmul.f32 %v1818_v15, %v869_v1 }
 0x20a   :  { %v873_v29 = vmul.f32 %v1077_v8, %v849_v25 }
 0x20b   :  { %v885_v9 = vmul.f32 %v1818_v15, %v870_v30  ;;  %v899_v16 = vadd.f32 %v1824_v43, %v884_v57 }
 0x20c   :  { %v1079_v13 = vpop.eup %1078  ;;  %v888_v59 = vmul.f32 %v1818_v15, %v873_v29 }
 0x20d   :  { %v900_v23 = vadd.f32 %v1824_v43, %v885_v9  ;;  %907 = vst [vmem:[#allocation8 + $0x10] sm:$0xff] %v899_v16  ;;  %v874_v24 = vmul.f32 %v1079_v13, %v850_v21 }
 0x20e   :  { %v903_v41 = vadd.f32 %v1824_v43, %v888_v59 }
 0x20f   :  { %908 = vst [vmem:[#allocation8 + $0x18] sm:$0xff] %v900_v23  ;;  %v889_v31 = vmul.f32 %v1818_v15, %v874_v24 }
 0x210   :  { %911 = vst [vmem:[#allocation8 + $0x30] sm:$0xff] %v903_v41 }
 0x211   :  { %v904_v3 = vadd.f32 %v1824_v43, %v889_v31 }
 0x213   :  { %912 = vst [vmem:[#allocation8 + $0x38] sm:$0xff] %v904_v3 }
 0x214   :  { %1157 = shalt.err (!%p1154_p0)
}
 0x215   :  { %s1158_s22 = scalar_lea.hbm %s1870_s7, 1024 }
 0x216   :  { %p1159_p1 = scmp.ne.s32.totalorder %s1870_s7, %s1158_s22  ;;  %p1162_p2 = scmp.lt.u32.totalorder %s1158_s22, %s1870_s7 }
 0x218   :  { %p1164_p3 = pnand %p1162_p2, %p1159_p1 }
 0x21a   :  { %1167 = shalt.err (!%p1164_p3)
}
 0x21b   :  { %924 = dma.vmem_to_hbm [thread:$0]  %s919_s6, 1024, %s1870_s7, [#allocation4], %s1176_s1, %s1176_s1, %s1177_s23  }
 0x21c   :  { %1172 = dma.done.wait [#allocation4], 1024  }
 0x21d   :  { %1173 = vsyncadd [#allocation4], 4294966272 }
 0x21e   :  { %928 = vsyncpa [#allocation3], 1 }
 0x21f   :  { %929 = vsyncpa [#allocation6], 1 }
 0x220   :  { %930 = vsyncpa [#allocation4], 1 }

</bundles_post_ra>
